<compile_context>
chip_gen: v6e
topology: v6e:2x2x1
jax: 0.10.0
libtpu: 0.0.40
codegen_flags: <defaults>
</compile_context>

<pallas_src>
import math

import jax
import jax.numpy as jnp
from jax.experimental import pallas as pl
from jax.experimental.pallas import tpu as pltpu

LN_EPS = 1e-5  # nn.LayerNorm default (the module's eps kwarg is unused)


def _round_up(x, m):
    return ((x + m - 1) // m) * m


def _sublane_multiple(dtype) -> int:
    # 8 rows for 4-byte dtypes, 16 for bf16/f16, 32 for int8/fp8.
    return max(8, 32 // jnp.dtype(dtype).itemsize)


# ---------------- kernel ----------------

def _addnorm_kernel(x_ref, sub_ref, gamma_ref, beta_ref, o_ref):
    # Layout: (tile_rows, H); per-row LayerNorm reduction along the lane (last) axis.
    x = x_ref[...].astype(jnp.float32)
    s = x + sub_ref[...].astype(jnp.float32)
    inv_h = jnp.float32(1.0 / s.shape[-1])
    # Single-pass moments: both reductions are independent (can overlap on the XLU)
    # and no extra full-tile centered temporary is kept live.
    sum_s = jnp.sum(s, axis=-1, keepdims=True)
    sum_s2 = jnp.sum(s * s, axis=-1, keepdims=True)
    mean = sum_s * inv_h
    var = jnp.maximum(sum_s2 * inv_h - mean * mean, 0.0)
    inv_std = jax.lax.rsqrt(var + LN_EPS)
    gamma = gamma_ref[...].astype(jnp.float32)   # (1, H), VMEM-resident
    beta = beta_ref[...].astype(jnp.float32)     # (1, H), VMEM-resident
    y = x + (s - mean) * inv_std * gamma + beta
    o_ref[...] = y.astype(o_ref.dtype)


# ---------------- wrapper ----------------

def add_norm(x, sublayer, gamma, beta, *, tile_rows=None):
    """x, sublayer: (..., H); gamma, beta: (H,). Returns x + LayerNorm(x + sublayer)."""
    orig_shape = x.shape
    H = orig_shape[-1]
    R = math.prod(orig_shape[:-1]) if len(orig_shape) > 1 else 1

    dtype_bytes = jnp.dtype(x.dtype).itemsize
    sub_mult = _sublane_multiple(x.dtype)

    if tile_rows is None:
        # ~2 MiB per stream tile; >= ~8 grid steps (4 per TC on v7x) for pipelining.
        budget_rows = (2 * 1024 * 1024) // max(1, H * dtype_bytes)
        tr = min(budget_rows, 1024, pl.cdiv(R, 8))
        tr = max(sub_mult, (tr // sub_mult) * sub_mult)
    else:
        tr = max(sub_mult, _round_up(tile_rows, sub_mult))

    grid = (pl.cdiv(R, tr),)  # ragged last block: OOB rows are masked on store

    x2 = x.reshape(R, H)
    s2 = sublayer.reshape(R, H)
    g2 = gamma.reshape(1, H)
    b2 = beta.reshape(1, H)

    tile_bytes = tr * H * dtype_bytes
    vmem_limit = int(min(48 * 2**20, max(32 * 2**20, 8 * tile_bytes)))

    out = pl.pallas_call(
        _addnorm_kernel,
        out_shape=jax.ShapeDtypeStruct((R, H), x.dtype),
        grid_spec=pltpu.PrefetchScalarGridSpec(
            num_scalar_prefetch=0,
            grid=grid,
            in_specs=[
                pl.BlockSpec((tr, H), lambda i: (i, 0)),
                pl.BlockSpec((tr, H), lambda i: (i, 0)),
                pl.BlockSpec(memory_space=pltpu.MemorySpace.VMEM),  # gamma, resident
                pl.BlockSpec(memory_space=pltpu.MemorySpace.VMEM),  # beta, resident
            ],
            out_specs=pl.BlockSpec((tr, H), lambda i: (i, 0)),
        ),
        compiler_params=pltpu.CompilerParams(
            dimension_semantics=("parallel",),
            vmem_limit_bytes=vmem_limit,
        ),
        cost_estimate=pl.CostEstimate(
            flops=10 * R * H,
            transcendentals=R,
            bytes_accessed=3 * R * H * dtype_bytes + 2 * H * dtype_bytes,
        ),
    )(x2, s2, g2, b2)
    return out.reshape(orig_shape)


# ---------------- reference & test ----------------

def _reference(x, sublayer, gamma, beta):
    x = x.astype(jnp.float32)
    s = x + sublayer.astype(jnp.float32)
    mu = jnp.mean(s, axis=-1, keepdims=True)
    var = jnp.mean((s - mu) ** 2, axis=-1, keepdims=True)
    return x + (s - mu) / jnp.sqrt(var + LN_EPS) * gamma.astype(jnp.float32) \
        + beta.astype(jnp.float32)


if __name__ == "__main__":
    key = jax.random.PRNGKey(0)
    ok = True

    cases = [
        ((2, 8, 32), jnp.float32, 1e-4),    # small hidden
        ((2, 8, 256), jnp.float32, 1e-4),   # typical hidden
        ((2, 7, 160), jnp.float32, 1e-4),   # ragged last row block (R=14, tr=8)
        ((2, 8, 128), jnp.bfloat16, 5e-2),  # bf16 path (sublane multiple 16)
    ]

    for shape, dt, tol in cases:
        hidden = shape[-1]
        key, kx, ks, kg, kb = jax.random.split(key, 5)
        x = jax.random.normal(kx, shape, dtype=jnp.float32).astype(dt)
        sublayer = jax.random.normal(ks, shape, dtype=jnp.float32).astype(dt)
        gamma = (1.0 + 0.1 * jax.random.normal(kg, (hidden,), dtype=jnp.float32)).astype(dt)
        beta = (0.1 * jax.random.normal(kb, (hidden,), dtype=jnp.float32)).astype(dt)

        out = add_norm(x, sublayer, gamma, beta)
        jax.block_until_ready(out)

        ref = _reference(x, sublayer, gamma, beta)
        err = float(jnp.max(jnp.abs(out.astype(jnp.float32) - ref)))
        if err > tol:
            ok = False
            print(f"MISMATCH at shape {shape} dtype {dt}: max err {err}")

    if ok:
        print("KERNEL_OK")
</pallas_src>

<mosaic_0001>
module attributes {stable_mosaic.version = 11 : i64} {
  func.func @_addnorm_kernel(%arg0: i32, %arg1: memref<8x32xf32, #tpu.memory_space<vmem>>, %arg2: memref<8x32xf32, #tpu.memory_space<vmem>>, %arg3: memref<1x32xf32, #tpu.memory_space<vmem>>, %arg4: memref<1x32xf32, #tpu.memory_space<vmem>>, %arg5: memref<8x32xf32, #tpu.memory_space<vmem>>) attributes {dimension_semantics = [#tpu.dimension_semantics<parallel>], iteration_bounds = array<i64: 2>, scalar_prefetch = 0 : i64, scratch_operands = 0 : i64, tpu.core_type = #tpu.core_type<tc>, window_params = [{transform_indices = @transform_0, window_bounds = array<i64: 8, 32>}, {transform_indices = @transform_1, window_bounds = array<i64: 8, 32>}, {pipeline_mode = #tpu.pipeline_mode<synchronous>, transform_indices = @transform_2, window_bounds = array<i64: 1, 32>}, {pipeline_mode = #tpu.pipeline_mode<synchronous>, transform_indices = @transform_3, window_bounds = array<i64: 1, 32>}, {transform_indices = @transform_4, window_bounds = array<i64: 8, 32>}]} {
    %c0 = arith.constant 0 : index
    %c0_0 = arith.constant 0 : index
    %0 = vector.load %arg1[%c0, %c0_0] : memref<8x32xf32, #tpu.memory_space<vmem>>, vector<8x32xf32>
    %c0_1 = arith.constant 0 : index
    %c0_2 = arith.constant 0 : index
    %1 = vector.load %arg2[%c0_1, %c0_2] : memref<8x32xf32, #tpu.memory_space<vmem>>, vector<8x32xf32>
    %2 = arith.addf %0, %1 : vector<8x32xf32>
    %cst = arith.constant dense<0.000000e+00> : vector<8xf32>
    %3 = vector.multi_reduction <add>, %2, %cst [1] : vector<8x32xf32> to vector<8xf32>
    %4 = vector.shape_cast %3 : vector<8xf32> to vector<8x1xf32>
    %5 = arith.mulf %2, %2 : vector<8x32xf32>
    %cst_3 = arith.constant dense<0.000000e+00> : vector<8xf32>
    %6 = vector.multi_reduction <add>, %5, %cst_3 [1] : vector<8x32xf32> to vector<8xf32>
    %7 = vector.shape_cast %6 : vector<8xf32> to vector<8x1xf32>
    %cst_4 = arith.constant 3.125000e-02 : f32
    %8 = vector.broadcast %cst_4 : f32 to vector<8x1xf32>
    %9 = arith.mulf %4, %8 : vector<8x1xf32>
    %cst_5 = arith.constant 3.125000e-02 : f32
    %10 = vector.broadcast %cst_5 : f32 to vector<8x1xf32>
    %11 = arith.mulf %7, %10 : vector<8x1xf32>
    %12 = arith.mulf %9, %9 : vector<8x1xf32>
    %13 = arith.subf %11, %12 : vector<8x1xf32>
    %cst_6 = arith.constant 0.000000e+00 : f32
    %14 = vector.broadcast %cst_6 : f32 to vector<8x1xf32>
    %15 = arith.maximumf %13, %14 : vector<8x1xf32>
    %cst_7 = arith.constant 9.99999974E-6 : f32
    %16 = vector.broadcast %cst_7 : f32 to vector<8x1xf32>
    %17 = arith.addf %15, %16 : vector<8x1xf32>
    %18 = math.rsqrt %17 : vector<8x1xf32>
    %c0_8 = arith.constant 0 : index
    %c0_9 = arith.constant 0 : index
    %19 = vector.load %arg3[%c0_8, %c0_9] : memref<1x32xf32, #tpu.memory_space<vmem>>, vector<1x32xf32>
    %c0_10 = arith.constant 0 : index
    %c0_11 = arith.constant 0 : index
    %20 = vector.load %arg4[%c0_10, %c0_11] : memref<1x32xf32, #tpu.memory_space<vmem>>, vector<1x32xf32>
    %21 = vector.broadcast %9 : vector<8x1xf32> to vector<8x32xf32>
    %22 = arith.subf %2, %21 : vector<8x32xf32>
    %23 = vector.broadcast %18 : vector<8x1xf32> to vector<8x32xf32>
    %24 = arith.mulf %22, %23 : vector<8x32xf32>
    %25 = vector.broadcast %19 : vector<1x32xf32> to vector<8x32xf32>
    %26 = arith.mulf %24, %25 : vector<8x32xf32>
    %27 = arith.addf %0, %26 : vector<8x32xf32>
    %28 = vector.broadcast %20 : vector<1x32xf32> to vector<8x32xf32>
    %29 = arith.addf %27, %28 : vector<8x32xf32>
    %c0_12 = arith.constant 0 : index
    %c0_13 = arith.constant 0 : index
    %30 = vector.load %arg5[%c0_12, %c0_13] : memref<8x32xf32, #tpu.memory_space<vmem>>, vector<8x32xf32>
    tpu.vector_store %arg5[%c0_12, %c0_13], %29 {strides = array<i32>} : memref<8x32xf32, #tpu.memory_space<vmem>>, vector<8x32xf32>,
    return
  }
  func.func @transform_0(%arg0: i32) -> (i32, i32) {
    %c0_i32 = arith.constant 0 : i32
    %c0_i32_0 = arith.constant 0 : i32
    return %arg0, %c0_i32 : i32, i32
  }
  func.func @transform_1(%arg0: i32) -> (i32, i32) {
    %c0_i32 = arith.constant 0 : i32
    %c0_i32_0 = arith.constant 0 : i32
    return %arg0, %c0_i32 : i32, i32
  }
  func.func @transform_2(%arg0: i32) -> (i32, i32) {
    %c0_i32 = arith.constant 0 : i32
    %c0_i32_0 = arith.constant 0 : i32
    %c0_i32_1 = arith.constant 0 : i32
    return %c0_i32, %c0_i32_0 : i32, i32
  }
  func.func @transform_3(%arg0: i32) -> (i32, i32) {
    %c0_i32 = arith.constant 0 : i32
    %c0_i32_0 = arith.constant 0 : i32
    %c0_i32_1 = arith.constant 0 : i32
    return %c0_i32, %c0_i32_0 : i32, i32
  }
  func.func @transform_4(%arg0: i32) -> (i32, i32) {
    %c0_i32 = arith.constant 0 : i32
    %c0_i32_0 = arith.constant 0 : i32
    return %arg0, %c0_i32 : i32, i32
  }
}

</mosaic_0001>

<bundles_post_ra>
// kernel: tpu_custom_call.1
= control target key start
LH: loop header
LB: loop body
LE: loop exit
PB: predicated region body
PF: predicated region fallthrough
CT: control target
= control target key end

     0   :  { %9 = vsyncpa [#allocation3], 0  ;;  %s827_s0 = inlined_call_operand.hbm [shape: f32[16,32], index: 0, kind: input, shape index: {}]   ;;  %s828_s1 = inlined_call_operand.hbm [shape: f32[16,32], index: 1, kind: input, shape index: {}]   ;;  %s829_s2 = inlined_call_operand.vmem [shape: f32[1,32], index: 2, kind: input, shape index: {}]   ;;  %s830_s3 = inlined_call_operand.vmem [shape: f32[1,32], index: 3, kind: input, shape index: {}]   ;;  %s831_s4 = inlined_call_operand.hbm [shape: f32[16,32], index: 4, kind: output, shape index: {}]  }
   0x1   :  { %11 = vsyncpa [#allocation3 + $0x1], 0 }
   0x2   :  { %12 = vsyncpa [#allocation6], 0 }
   0x3   :  { %14 = vsyncpa [#allocation6 + $0x1], 0 }
   0x4   :  { %15 = vsyncpa [#allocation4], 0 }
   0x5   :  { %17 = vsyncpa [#allocation4 + $0x1], 0  ;;  %s619_s15 = smov 0   ;;  %s621_s16 = smov 0  }
   0x6   :  { %s623_s17 = smov 0   ;;  %s625_s18 = smov 0  }
   0x7 LB: > { %s640_s19 = sadd.s32 4294967295, %s589_s18   ;;  %s395_s20 = sadd.s32 4294967294, %s589_s18   ;;  %s589_s18 = sphi %s625_s18, %s850_s18   ;;  %s585_s17 = sphi %s623_s17, %s849_s17   ;;  %s581_s16 = sphi %s621_s16, %s848_s16   ;;  %s577_s15 = sphi %s619_s15, %s847_s15  }
   0x8   : > { %s644_s21 = sadd.s32 1, %s589_s18   ;;  %s30_s22 = sadd.s32 1, %s585_s17 }
   0x9   : > { %s27_s23 = ssub.s32 %s589_s18, %s644_s21  ;;  %p37_p0 = scmp.ne.s32.totalorder %s585_s17, %s581_s16 }
   0xa   : > { %p28_p1 = scmp.eq.s32.totalorder %s27_s23, 0  ;;  %p38_p2 = scmp.eq.s32.totalorder %s589_s18, 0 }
   0xb   : > { %p43_p3 = scmp.ne.s32.totalorder %s581_s16, %s577_s15  ;;  %p44_p4 = scmp.eq.s32.totalorder %s640_s19, 0 }
   0xc   : > { %s656_s24 = scalar_select %p28_p1, %s585_s17, %s30_s22  }
   0xd   : > { %p658_p5 = por %p38_p2, %p37_p0  ;;  %p662_p6 = por %p44_p4, %p43_p3 }
   0xe   : > { %p135_p7 = scmp.eq.s32.totalorder %s640_s19, 1  ;;  %p141_p8 = scmp.eq.s32.totalorder %s395_s20, 1 }
   0xf   : > { %s835_s26 = scalar_select %p662_p6, 1, 0 }
  0x10   : > { %p429_p10 = scmp.lt.s32.totalorder %s589_s18, 2  ;;  %p669_p11 = por %p135_p7, %p37_p0 }
  0x11   : > { %p673_p12 = por %p141_p8, %p43_p3  ;;  %s678_s29 = sand.u32 1, %s585_s17  }
  0x12   : > { %s836_s27 = scalar_select %p669_p11, 1, 0 }
  0x13   : > { %s837_s28 = scalar_select %p673_p12, 1, 0 }
  0x14   : > { %s399_s30 = sshll.u32 %s589_s18, 7  ;;  %s398_s5 = sshll.u32 %s678_s29, 3 }
  0x15   : > { %s687_s8 = scalar_lea.hbm %s827_s0, %s399_s30  ;;  %s171_s9 = scalar_lea.vmem [#allocation2], %s398_s5 }
  0x16   : > { %s178_s10 = sshll.u32 %s171_s9, 4  ;;  %p693_p13 = pnand %p429_p10, %p658_p5  ;;  %s697_s10 = int_to_ptr.vmem [resolvable:$true] %s178_s10 }
  0x17   : > { %s168_s12 = scalar_lea.sflag [#allocation3], %s678_s29  ;;  %s465_s13 = scalar_lea.hbm %s687_s8, 128 }
  0x18   : > { %p466_p2 = scmp.ne.s32.totalorder %s687_s8, %s465_s13  ;;  %p467_p3 = pneg %p693_p13 }
  0x19   : > { %s470_s22 = scalar_lea.hbm %s827_s0, 256  ;;  %p471_p5 = scmp.lt.s32.totalorder %s687_s8, %s827_s0 }
  0x1a   : > { %p468_p4 = pnand %p467_p3, %p466_p2  ;;  %p472_p8 = scmp.lt.s32.totalorder %s470_s22, %s465_s13 }
  0x1c   : > { %p469_p7 = pneg %p468_p4  ;;  %p473_p10 = por %p472_p8, %p471_p5 }
  0x1e   : > { %p474_p9 = pnand %p473_p10, %p469_p7 }
  0x20   : > { %477 = shalt.err (!%p474_p9)
}
  0x21   : > { %s478_s6 = scalar_lea.vmem %s697_s10, 128  ;;  %s591_s7 = smov [#allocation2]  }
  0x22   : > { %p479_p0 = scmp.ne.s32.totalorder %s697_s10, %s478_s6  ;;  %s483_s9 = sshll.u32 %s591_s7, 4  ;;  %s484_s9 = int_to_ptr.vmem [resolvable:$false] %s483_s9 }
  0x23   : > { %s485_s14 = scalar_lea.vmem %s484_s9, 256  ;;  %p486_p1 = scmp.lt.s32.totalorder %s697_s10, %s484_s9 }
  0x24   : > { %p481_p2 = pnand %p479_p0, %p467_p3  ;;  %p487_p12 = scmp.lt.s32.totalorder %s485_s14, %s478_s6 }
  0x26   : > { %p482_p4 = pneg %p481_p2  ;;  %p488_p11 = por %p487_p12, %p486_p1 }
  0x28   : > { %p489_p5 = pnand %p488_p11, %p482_p4 }
  0x2a   : > { %492 = shalt.err (!%p489_p5)
}
  0x2b   : > { %421 = dma.hbm_to_vmem [thread:$0]  (!%p693_p13), %s687_s8, 128, %s697_s10, %s168_s12  }
  0x2c   : > { %p839_p9 = scmp.lt.s32.totalorder %s589_s18, 3  ;;  %p840_p0 = scmp.ge.s32.totalorder %s589_s18, 1 }
  0x2d   : > { %s739_s23 = scalar_lea.hbm %s828_s1, %s399_s30  ;;  %s189_s25 = scalar_lea.vmem [#allocation5], %s398_s5 }
  0x2e   : > { %p730_p7 = pnand %p840_p0, %p839_p9  ;;  %s196_s6 = sshll.u32 %s189_s25, 4  ;;  %s197_s6 = int_to_ptr.vmem [resolvable:$true] %s196_s6 }
  0x2f   : > { %s186_s8 = scalar_lea.sflag [#allocation6], %s678_s29  ;;  %s493_s10 = scalar_lea.hbm %s739_s23, 128 }
  0x30   : > { %s841_s13 = scalar_select %p730_p7, 1, 0 }
  0x31   : > { %p494_p11 = scmp.ne.s32.totalorder %s739_s23, %s493_s10  ;;  %s498_s9 = scalar_lea.hbm %s828_s1, 256 }
  0x32   : > { %p499_p8 = scmp.lt.s32.totalorder %s739_s23, %s828_s1  ;;  %p500_p10 = scmp.lt.s32.totalorder %s498_s9, %s493_s10 }
  0x33   : > { %p496_p12 = pnand %p494_p11, %p467_p3 }
  0x34   : > { %p501_p2 = por %p500_p10, %p499_p8 }
  0x35   : > { %p497_p1 = pneg %p496_p12 }
  0x37   : > { %p502_p4 = pnand %p501_p2, %p497_p1 }
  0x39   : > { %505 = shalt.err (!%p502_p4)
}
  0x3a   : > { %s506_s5 = scalar_lea.vmem %s197_s6, 128  ;;  %s592_s29 = smov [#allocation5]  }
  0x3b   : > { %p507_p5 = scmp.ne.s32.totalorder %s197_s6, %s506_s5  ;;  %s511_s20 = sshll.u32 %s592_s29, 4  ;;  %s512_s20 = int_to_ptr.vmem [resolvable:$false] %s511_s20 }
  0x3c   : > { %s513_s22 = scalar_lea.vmem %s512_s20, 256  ;;  %p514_p11 = scmp.lt.s32.totalorder %s197_s6, %s512_s20 }
  0x3d   : > { %p509_p9 = pnand %p507_p5, %p467_p3  ;;  %p515_p12 = scmp.lt.s32.totalorder %s513_s22, %s506_s5 }
  0x3f   : > { %p510_p0 = pneg %p509_p9  ;;  %p516_p6 = por %p515_p12, %p514_p11 }
  0x41   : > { %p517_p7 = pnand %p516_p6, %p510_p0 }
  0x43   : > { %520 = shalt.err (!%p517_p7)
}
  0x44   : > { %424 = dma.hbm_to_vmem [thread:$0]  (!%p693_p13), %s739_s23, 128, %s197_s6, %s186_s8  }
  0x45   : > { %p842_p1 = scmp.ne.s32.totalorder %s841_s13, 0 }
  0x46   : > { %s765_s25 = sand.u32 (!%p842_p1), 1, %s581_s16   ;;  %p843_p6 = scmp.ne.s32.totalorder (!%p842_p1), %s835_s26, 0 }
  0x47   : > { %205 = sbr.rel (%p842_p1) target bundleno = 268 (0x10c), region = 36  ;;  %s768_s10 = sshll.u32 (!%p842_p1), %s765_s25, 3 }
  0x48   : > { %s208_s12 = scalar_lea.sflag (!%p842_p1), [#allocation3], %s765_s25  ;;  %s211_s7 = scalar_lea.vmem (!%p842_p1), [#allocation2], %s768_s10 }
  0x4c   : > { %564 = dma.done.wait (%p843_p6), %s208_s12, 128  }
  0x4d   : > { %566 = vsyncadd (%p843_p6), %s208_s12, 4294967168  ;;  %s217_s11 = scalar_lea.sflag [#allocation6], %s765_s25  ;;  %s220_s13 = scalar_lea.vmem [#allocation5], %s768_s10 }
  0x4e   : > { %568 = dma.done.wait (%p843_p6), %s217_s11, 128  }
  0x4f   : > { %570 = vsyncadd (%p843_p6), %s217_s11, 4294967168  ;;  %v250_v0 = vld [vmem:[%s211_s7] sm:$0xff]  ;;  %v251_v1 = vld [vmem:[%s220_s13] sm:$0xff]  ;;  %vm253_vm0 = vcmask 261120   ;;  %s409_s9 = sshll.u32 %s640_s19, 7  ;;  %s249_s30 = scalar_lea.vmem [#allocation7], %s768_s10 }
  0x50   : > { %v252_v2 = vadd.f32 %v251_v1, %v250_v0  ;;  %v406_v16 = vld [vmem:[%s829_s2] ss:$0 sm:$0xff]  ;;  %s302_s14 = sshll.u32 %s249_s30, 4  ;;  %s300_s20 = scalar_lea.hbm %s831_s4, %s409_s9  ;;  %s303_s14 = int_to_ptr.vmem [resolvable:$true] %s302_s14 }
  0x51   : > { %v407_v19 = vld [vmem:[%s830_s3] ss:$0 sm:$0xff]  ;;  %s289_s22 = scalar_lea.sflag [#allocation4], %s765_s25  ;;  %s521_s12 = scalar_lea.vmem %s303_s14, 128 }
  0x52   : > { %v254_v3 = vsel %vm253_vm0, %v252_v2, 0.0  ;;  %v257_v4 = vmul.f32 %v252_v2, %v252_v2  ;;  %p522_p13 = scmp.ne.s32.totalorder %s303_s14, %s521_s12  ;;  %p844_p3 = scmp.ne.s32.totalorder %s836_s27, 0 }
  0x53   : > { %255 = vadd.xlane.f32.xlu0 %v254_v3  ;;  %s593_s7 = smov [#allocation7]  }
  0x54   : > { %v258_v5 = vsel %vm253_vm0, %v257_v4, 0.0  ;;  %p523_p7 = pnand %p522_p13, %p844_p3  ;;  %s525_s11 = sshll.u32 %s593_s7, 4  ;;  %s526_s11 = int_to_ptr.vmem [resolvable:$false] %s525_s11 }
  0x55   : > { %s527_s19 = scalar_lea.vmem %s526_s11, 256  ;;  %p528_p10 = scmp.lt.s32.totalorder %s303_s14, %s526_s11 }
  0x56   : > { %p524_p8 = pneg %p523_p7  ;;  %p529_p2 = scmp.lt.s32.totalorder %s527_s19, %s521_s12 }
  0x57   : > { %259 = vadd.xlane.f32.xlu0 %v258_v5 }
  0x58   : > { %p530_p4 = por %p529_p2, %p528_p10 }
  0x5a   : > { %p531_p5 = pnand %p530_p4, %p524_p8 }
  0xdc   : > { %v256_v6 = vpop.xlane.xlu0 %255 }
  0xdd   : > { %v261_v7 = vmul.f32 0.03125, %v256_v6 }
  0xdf   : > { %v263_v9 = vmul.f32 %v261_v7, %v261_v7  ;;  %v270_v14 = vsub.f32 %v252_v2, %v261_v7 }
  0xe0   : > { %v260_v8 = vpop.xlane.xlu0 %259 }
  0xe1   : > { %v262_v10 = vmul.f32 0.03125, %v260_v8 }
  0xe3   : > { %v264_v11 = vsub.f32 %v262_v10, %v263_v9 }
  0xe5   : > { %v265_v12 = vmax.f32 %v264_v11, 0.0 }
  0xe7   : > { %v266_v13 = vadd.f32 1e-05, %v265_v12 }
  0xe9   : > { %463 = vrsqrt.f32 %v266_v13 }
  0xf6   : > { %v464_v15 = vpop.eup %463 }
  0xf7   : > { %v271_v17 = vmul.f32 %v464_v15, %v270_v14 }
  0xf9   : > { %v278_v18 = vmul.f32 %v406_v16, %v271_v17 }
  0xfb   : > { %v279_v20 = vadd.f32 %v278_v18, %v250_v0 }
  0xfd   : > { %v286_v21 = vadd.f32 %v407_v19, %v279_v20 }
  0xff   : > { %287 = vst.msk [vmem:[%s249_s30] sm:$0xff] %vm253_vm0, %v286_v21 }
 0x100   : > { %534 = shalt.err (!%p531_p5)
}
 0x101   : > { %s535_s10 = scalar_lea.hbm %s300_s20, 128  ;;  %s539_s26 = scalar_lea.hbm %s831_s4, 256 }
 0x102   : > { %p536_p9 = scmp.ne.s32.totalorder %s300_s20, %s535_s10  ;;  %p540_p12 = scmp.lt.s32.totalorder %s300_s20, %s831_s4 }
 0x103   : > { %p541_p1 = scmp.lt.s32.totalorder %s539_s26, %s535_s10 }
 0x104   : > { %p537_p0 = pnand %p536_p9, %p844_p3 }
 0x105   : > { %p542_p6 = por %p541_p1, %p540_p12 }
 0x106   : > { %p538_p11 = pneg %p537_p0 }
 0x108   : > { %p543_p13 = pnand %p542_p6, %p538_p11 }
 0x10a   : > { %546 = shalt.err (!%p543_p13)
}
 0x10b   : > { %416 = dma.vmem_to_hbm [thread:$0]  (%p844_p3), %s303_s14, 128, %s300_s20, %s289_s22  }
 0x10c PF: > { %s314_s8 = sand.u32 1, %s577_s15   ;;  %p845_p7 = scmp.ne.s32.totalorder %s837_s28, 0 }
 0x10d   : > { %p846_p8 = scmp.ge.s32.totalorder %s589_s18, 2  ;;  %s315_s9 = scalar_lea.sflag [#allocation4], %s314_s8 }
 0x10f   : > { %p426_p10 = pnand %p846_p8, %p845_p7 }
 0x111   : > { %p427_p2 = pneg %p426_p10 }
 0x113   : > { %572 = dma.done.wait (%p427_p2), %s315_s9, 128  }
 0x114   : > { %574 = vsyncadd (%p427_p2), %s315_s9, 4294967168  ;;  %p20_p4 = scmp.ge.s32.totalorder %s644_s21, 4   ;;  %s847_s15 = smov %s581_s16 }
 0x115   : > { %s848_s16 = smov %s585_s17  ;;  %s849_s17 = smov %s656_s24 }
 0x116   : > { %s850_s18 = smov %s644_s21  ;;  %22 = sbr.rel (!%p20_p4) target bundleno = 7 (0x7), region = 94 }
 0x11b   :  { %320 = vsyncpa [#allocation3], 1 }
 0x11c   :  { %322 = vsyncpa [#allocation3 + $0x1], 1 }
 0x11d   :  { %323 = vsyncpa [#allocation6], 1 }
 0x11e   :  { %325 = vsyncpa [#allocation6 + $0x1], 1 }
 0x11f   :  { %326 = vsyncpa [#allocation4], 1 }
 0x120   :  { %328 = vsyncpa [#allocation4 + $0x1], 1 }

</bundles_post_ra>
